<compile_context>
chip_gen: v5e
topology: v5e:2x2
jax: 0.10.0
libtpu: 0.0.40
codegen_flags: <defaults>
</compile_context>

<pallas_src>
import jax
import jax.numpy as jnp
from jax.experimental import pallas as pl
from jax.experimental.pallas import tpu as pltpu


# Flat parameter layout inside the (22,) SMEM vector:
#   w1[i, j] -> p[i*4 + j]        (fc1 weight, (in=2, out=4))
#   b1[j]    -> p[8 + j]
#   w2[j, k] -> p[12 + j*2 + k]   (fc2 weight, (in=4, out=2))
#   b2[k]    -> p[20 + k]
_W1_OFF, _B1_OFF, _W2_OFF, _B2_OFF = 0, 8, 12, 20


def xor_kernel(p_ref, x_ref, o_ref):
    x = x_ref[...]                 # (2, TILE) f32, feature-major
    x0 = x[0:1, :]                 # (1, TILE)
    x1 = x[1:2, :]

    # fc1 + ReLU: h_j = relu(x0*w1[0,j] + x1*w1[1,j] + b1[j]), j = 0..3
    h = []
    for j in range(4):
        hj = (x0 * p_ref[_W1_OFF + j]
              + x1 * p_ref[_W1_OFF + 4 + j]
              + p_ref[_B1_OFF + j])
        h.append(jnp.maximum(hj, 0.0))

    # fc2 + ReLU: y_k = relu(sum_j h_j*w2[j,k] + b2[k]), k = 0..1
    ys = []
    for k in range(2):
        acc = h[0] * p_ref[_W2_OFF + k]
        for j in range(1, 4):
            acc = acc + h[j] * p_ref[_W2_OFF + j * 2 + k]
        acc = acc + p_ref[_B2_OFF + k]
        ys.append(jnp.maximum(acc, 0.0))

    o_ref[...] = jnp.concatenate(ys, axis=0)     # (2, TILE)


def xor_forward(x, w1, b1, w2, b2, *, max_tile=32768):
    """Forward pass matching torch: relu(fc2(relu(fc1(x.view(-1, 2)))))."""
    # Mirrors torch's x.view(-1, 2): total element count must be even.
    x2 = x.reshape(-1, 2).astype(jnp.float32)
    n = x2.shape[0]

    # All 22 parameters packed into one flat f32 vector -> SMEM scalars.
    params = jnp.concatenate([
        w1.astype(jnp.float32).reshape(-1),   # 8
        b1.astype(jnp.float32).reshape(-1),   # 4
        w2.astype(jnp.float32).reshape(-1),   # 8
        b2.astype(jnp.float32).reshape(-1),   # 2
    ])                                        # (22,)

    # Lane-dense, feature-major slabs: (2, n_pad), n_pad a multiple of tile.
    tile = int(min(max_tile, max(128, ((n + 127) // 128) * 128)))
    n_pad = ((n + tile - 1) // tile) * tile
    xt = jnp.pad(x2, ((0, n_pad - n), (0, 0))).T          # (2, n_pad)

    out_t = pl.pallas_call(
        xor_kernel,
        out_shape=jax.ShapeDtypeStruct((2, n_pad), jnp.float32),
        grid=(n_pad // tile,),
        in_specs=[
            pl.BlockSpec(memory_space=pltpu.MemorySpace.SMEM),   # params (22,)
            pl.BlockSpec((2, tile), lambda i: (0, i)),           # x slab
        ],
        out_specs=pl.BlockSpec((2, tile), lambda i: (0, i)),
        compiler_params=pltpu.CompilerParams(
            dimension_semantics=("parallel",)),
    )(params, xt)

    return out_t.T[:n]                                    # (n, 2) row-major


def init_params(key):
    # Deterministic init mimicking PyTorch's default Linear init:
    # U(-1/sqrt(fan_in), 1/sqrt(fan_in)) for both weight and bias.
    k1, k2, k3, k4 = jax.random.split(key, 4)
    bound1 = 1.0 / jnp.sqrt(2.0)   # fc1 fan_in = 2
    bound2 = 1.0 / jnp.sqrt(4.0)   # fc2 fan_in = 4
    # stored as (in, out) so the kernel computes x @ W
    w1 = jax.random.uniform(k1, (2, 4), jnp.float32, -bound1, bound1)
    b1 = jax.random.uniform(k2, (4,),   jnp.float32, -bound1, bound1)
    w2 = jax.random.uniform(k3, (4, 2), jnp.float32, -bound2, bound2)
    b2 = jax.random.uniform(k4, (2,),   jnp.float32, -bound2, bound2)
    return w1, b1, w2, b2


if __name__ == "__main__":
    key = jax.random.PRNGKey(0)
    pkey, xkey = jax.random.split(key)
    w1, b1, w2, b2 = init_params(pkey)

    def ref_fn(xx):
        xr = xx.reshape(-1, 2)
        return jnp.maximum(jnp.maximum(xr @ w1 + b1, 0.0) @ w2 + b2, 0.0)

    # Small XOR-style batch: 8 points in R^2.
    x_small = jax.random.uniform(xkey, (8, 2), jnp.float32, -1.0, 1.0)
    out_small = jax.block_until_ready(xor_forward(x_small, w1, b1, w2, b2))
    assert out_small.shape == (8, 2)
    assert jnp.allclose(out_small, ref_fn(x_small), atol=1e-5, rtol=1e-5)

    # Exercise padding + a multi-step grid (tile=128 -> n_pad=384, 3 steps).
    x_big = jax.random.uniform(jax.random.PRNGKey(1), (300, 2),
                               jnp.float32, -1.0, 1.0)
    out_big = jax.block_until_ready(
        xor_forward(x_big, w1, b1, w2, b2, max_tile=128))
    assert out_big.shape == (300, 2)
    assert jnp.allclose(out_big, ref_fn(x_big), atol=1e-5, rtol=1e-5)

    print("KERNEL_OK")
</pallas_src>

<mosaic_0001>
module attributes {stable_mosaic.version = 11 : i64} {
  func.func @xor_kernel(%arg0: i32, %arg1: memref<22xf32, #tpu.memory_space<smem>>, %arg2: memref<2x128xf32, #tpu.memory_space<vmem>>, %arg3: memref<2x128xf32, #tpu.memory_space<vmem>>) attributes {dimension_semantics = [#tpu.dimension_semantics<parallel>], iteration_bounds = array<i64: 1>, scalar_prefetch = 0 : i64, scratch_operands = 0 : i64, tpu.core_type = #tpu.core_type<tc>, window_params = [{transform_indices = @transform_0, window_bounds = array<i64: 22>}, {transform_indices = @transform_1, window_bounds = array<i64: 2, 128>}, {transform_indices = @transform_2, window_bounds = array<i64: 2, 128>}]} {
    %c0 = arith.constant 0 : index
    %c0_0 = arith.constant 0 : index
    %0 = vector.load %arg2[%c0, %c0_0] : memref<2x128xf32, #tpu.memory_space<vmem>>, vector<2x128xf32>
    %1 = vector.extract_strided_slice %0 {offsets = [0, 0], sizes = [1, 128], strides = [1, 1]} : vector<2x128xf32> to vector<1x128xf32>
    %2 = vector.extract_strided_slice %0 {offsets = [1, 0], sizes = [1, 128], strides = [1, 1]} : vector<2x128xf32> to vector<1x128xf32>
    %c0_1 = arith.constant 0 : index
    %3 = memref.load %arg1[%c0_1] : memref<22xf32, #tpu.memory_space<smem>>
    %4 = vector.broadcast %3 : f32 to vector<1x128xf32>
    %5 = arith.mulf %1, %4 : vector<1x128xf32>
    %c4 = arith.constant 4 : index
    %6 = memref.load %arg1[%c4] : memref<22xf32, #tpu.memory_space<smem>>
    %7 = vector.broadcast %6 : f32 to vector<1x128xf32>
    %8 = arith.mulf %2, %7 : vector<1x128xf32>
    %9 = arith.addf %5, %8 : vector<1x128xf32>
    %c8 = arith.constant 8 : index
    %10 = memref.load %arg1[%c8] : memref<22xf32, #tpu.memory_space<smem>>
    %11 = vector.broadcast %10 : f32 to vector<1x128xf32>
    %12 = arith.addf %9, %11 : vector<1x128xf32>
    %cst = arith.constant 0.000000e+00 : f32
    %13 = vector.broadcast %cst : f32 to vector<1x128xf32>
    %14 = arith.maximumf %12, %13 : vector<1x128xf32>
    %c1 = arith.constant 1 : index
    %15 = memref.load %arg1[%c1] : memref<22xf32, #tpu.memory_space<smem>>
    %16 = vector.broadcast %15 : f32 to vector<1x128xf32>
    %17 = arith.mulf %1, %16 : vector<1x128xf32>
    %c5 = arith.constant 5 : index
    %18 = memref.load %arg1[%c5] : memref<22xf32, #tpu.memory_space<smem>>
    %19 = vector.broadcast %18 : f32 to vector<1x128xf32>
    %20 = arith.mulf %2, %19 : vector<1x128xf32>
    %21 = arith.addf %17, %20 : vector<1x128xf32>
    %c9 = arith.constant 9 : index
    %22 = memref.load %arg1[%c9] : memref<22xf32, #tpu.memory_space<smem>>
    %23 = vector.broadcast %22 : f32 to vector<1x128xf32>
    %24 = arith.addf %21, %23 : vector<1x128xf32>
    %cst_2 = arith.constant 0.000000e+00 : f32
    %25 = vector.broadcast %cst_2 : f32 to vector<1x128xf32>
    %26 = arith.maximumf %24, %25 : vector<1x128xf32>
    %c2 = arith.constant 2 : index
    %27 = memref.load %arg1[%c2] : memref<22xf32, #tpu.memory_space<smem>>
    %28 = vector.broadcast %27 : f32 to vector<1x128xf32>
    %29 = arith.mulf %1, %28 : vector<1x128xf32>
    %c6 = arith.constant 6 : index
    %30 = memref.load %arg1[%c6] : memref<22xf32, #tpu.memory_space<smem>>
    %31 = vector.broadcast %30 : f32 to vector<1x128xf32>
    %32 = arith.mulf %2, %31 : vector<1x128xf32>
    %33 = arith.addf %29, %32 : vector<1x128xf32>
    %c10 = arith.constant 10 : index
    %34 = memref.load %arg1[%c10] : memref<22xf32, #tpu.memory_space<smem>>
    %35 = vector.broadcast %34 : f32 to vector<1x128xf32>
    %36 = arith.addf %33, %35 : vector<1x128xf32>
    %cst_3 = arith.constant 0.000000e+00 : f32
    %37 = vector.broadcast %cst_3 : f32 to vector<1x128xf32>
    %38 = arith.maximumf %36, %37 : vector<1x128xf32>
    %c3 = arith.constant 3 : index
    %39 = memref.load %arg1[%c3] : memref<22xf32, #tpu.memory_space<smem>>
    %40 = vector.broadcast %39 : f32 to vector<1x128xf32>
    %41 = arith.mulf %1, %40 : vector<1x128xf32>
    %c7 = arith.constant 7 : index
    %42 = memref.load %arg1[%c7] : memref<22xf32, #tpu.memory_space<smem>>
    %43 = vector.broadcast %42 : f32 to vector<1x128xf32>
    %44 = arith.mulf %2, %43 : vector<1x128xf32>
    %45 = arith.addf %41, %44 : vector<1x128xf32>
    %c11 = arith.constant 11 : index
    %46 = memref.load %arg1[%c11] : memref<22xf32, #tpu.memory_space<smem>>
    %47 = vector.broadcast %46 : f32 to vector<1x128xf32>
    %48 = arith.addf %45, %47 : vector<1x128xf32>
    %cst_4 = arith.constant 0.000000e+00 : f32
    %49 = vector.broadcast %cst_4 : f32 to vector<1x128xf32>
    %50 = arith.maximumf %48, %49 : vector<1x128xf32>
    %c12 = arith.constant 12 : index
    %51 = memref.load %arg1[%c12] : memref<22xf32, #tpu.memory_space<smem>>
    %52 = vector.broadcast %51 : f32 to vector<1x128xf32>
    %53 = arith.mulf %14, %52 : vector<1x128xf32>
    %c14 = arith.constant 14 : index
    %54 = memref.load %arg1[%c14] : memref<22xf32, #tpu.memory_space<smem>>
    %55 = vector.broadcast %54 : f32 to vector<1x128xf32>
    %56 = arith.mulf %26, %55 : vector<1x128xf32>
    %57 = arith.addf %53, %56 : vector<1x128xf32>
    %c16 = arith.constant 16 : index
    %58 = memref.load %arg1[%c16] : memref<22xf32, #tpu.memory_space<smem>>
    %59 = vector.broadcast %58 : f32 to vector<1x128xf32>
    %60 = arith.mulf %38, %59 : vector<1x128xf32>
    %61 = arith.addf %57, %60 : vector<1x128xf32>
    %c18 = arith.constant 18 : index
    %62 = memref.load %arg1[%c18] : memref<22xf32, #tpu.memory_space<smem>>
    %63 = vector.broadcast %62 : f32 to vector<1x128xf32>
    %64 = arith.mulf %50, %63 : vector<1x128xf32>
    %65 = arith.addf %61, %64 : vector<1x128xf32>
    %c20 = arith.constant 20 : index
    %66 = memref.load %arg1[%c20] : memref<22xf32, #tpu.memory_space<smem>>
    %67 = vector.broadcast %66 : f32 to vector<1x128xf32>
    %68 = arith.addf %65, %67 : vector<1x128xf32>
    %cst_5 = arith.constant 0.000000e+00 : f32
    %69 = vector.broadcast %cst_5 : f32 to vector<1x128xf32>
    %70 = arith.maximumf %68, %69 : vector<1x128xf32>
    %c13 = arith.constant 13 : index
    %71 = memref.load %arg1[%c13] : memref<22xf32, #tpu.memory_space<smem>>
    %72 = vector.broadcast %71 : f32 to vector<1x128xf32>
    %73 = arith.mulf %14, %72 : vector<1x128xf32>
    %c15 = arith.constant 15 : index
    %74 = memref.load %arg1[%c15] : memref<22xf32, #tpu.memory_space<smem>>
    %75 = vector.broadcast %74 : f32 to vector<1x128xf32>
    %76 = arith.mulf %26, %75 : vector<1x128xf32>
    %77 = arith.addf %73, %76 : vector<1x128xf32>
    %c17 = arith.constant 17 : index
    %78 = memref.load %arg1[%c17] : memref<22xf32, #tpu.memory_space<smem>>
    %79 = vector.broadcast %78 : f32 to vector<1x128xf32>
    %80 = arith.mulf %38, %79 : vector<1x128xf32>
    %81 = arith.addf %77, %80 : vector<1x128xf32>
    %c19 = arith.constant 19 : index
    %82 = memref.load %arg1[%c19] : memref<22xf32, #tpu.memory_space<smem>>
    %83 = vector.broadcast %82 : f32 to vector<1x128xf32>
    %84 = arith.mulf %50, %83 : vector<1x128xf32>
    %85 = arith.addf %81, %84 : vector<1x128xf32>
    %c21 = arith.constant 21 : index
    %86 = memref.load %arg1[%c21] : memref<22xf32, #tpu.memory_space<smem>>
    %87 = vector.broadcast %86 : f32 to vector<1x128xf32>
    %88 = arith.addf %85, %87 : vector<1x128xf32>
    %cst_6 = arith.constant 0.000000e+00 : f32
    %89 = vector.broadcast %cst_6 : f32 to vector<1x128xf32>
    %90 = arith.maximumf %88, %89 : vector<1x128xf32>
    %91 = tpu.concatenate %70, %90 in 0 : vector<1x128xf32>, vector<1x128xf32> -> vector<2x128xf32>
    %c0_7 = arith.constant 0 : index
    %c0_8 = arith.constant 0 : index
    %92 = vector.load %arg3[%c0_7, %c0_8] : memref<2x128xf32, #tpu.memory_space<vmem>>, vector<2x128xf32>
    tpu.vector_store %arg3[%c0_7, %c0_8], %91 {strides = array<i32>} : memref<2x128xf32, #tpu.memory_space<vmem>>, vector<2x128xf32>,
    return
  }
  func.func @transform_0(%arg0: i32) -> i32 {
    %c0_i32 = arith.constant 0 : i32
    %c0_i32_0 = arith.constant 0 : i32
    return %c0_i32 : i32
  }
  func.func @transform_1(%arg0: i32) -> (i32, i32) {
    %c0_i32 = arith.constant 0 : i32
    %c0_i32_0 = arith.constant 0 : i32
    return %c0_i32, %arg0 : i32, i32
  }
  func.func @transform_2(%arg0: i32) -> (i32, i32) {
    %c0_i32 = arith.constant 0 : i32
    %c0_i32_0 = arith.constant 0 : i32
    return %c0_i32, %arg0 : i32, i32
  }
}

</mosaic_0001>

<bundles_post_ra>
// kernel: tpu_custom_call.1
= control target key start
LH: loop header
LB: loop body
LE: loop exit
PB: predicated region body
PF: predicated region fallthrough
CT: control target
= control target key end

     0   :  { %7 = vsyncpa [#allocation5], 0  ;;  %s293_s0 = inlined_call_operand.hbm [shape: f32[22], index: 0, kind: input, shape index: {}]   ;;  %s294_s1 = inlined_call_operand.hbm [shape: f32[2,128], index: 1, kind: input, shape index: {}]   ;;  %s295_s2 = inlined_call_operand.hbm [shape: f32[2,128], index: 2, kind: output, shape index: {}]  }
   0x1   :  { %8 = vsyncpa [#allocation3], 0 }
   0x2   :  { %9 = vsyncpa [#allocation4], 0  ;;  %s15_s11 = sshll.u32 %s293_s0, 4  ;;  %s24_s14 = sshll.u32 %s294_s1, 4  ;;  %s16_s11 = int_to_ptr.hbm [resolvable:$true] %s15_s11  ;;  %s25_s14 = int_to_ptr.hbm [resolvable:$true] %s24_s14 }
   0x3   :  { %s248_s15 = smov [#allocation2]   ;;  %s249_s16 = smov [#allocation6]  }
   0x4   :  { %18 = dma.hbm_to_smem %s16_s11, 16, %s248_s15, [#allocation5]  }
   0x5   :  { %s26_s17 = sshll.u32 %s249_s16, 4  ;;  %s27_s17 = int_to_ptr.vmem [resolvable:$true] %s26_s17 }
   0x6   :  { %29 = dma.hbm_to_vmem [thread:$0]  %s25_s14, 32, %s27_s17, [#allocation3]  }
   0x7   :  { %242 = dma.done.wait [#allocation5], 16  }
   0x8   :  { %243 = vsyncadd [#allocation5], 4294967280 }
   0x9   :  { %244 = dma.done.wait [#allocation3], 32  }
   0xa   :  { %245 = vsyncadd [#allocation3], 4294967264 }
   0xb   :  { %38 = sfence }
   0xc   :  { %s40_s18 = sld [smem:[#allocation2]]  ;;  %v39_v0 = vld [vmem:[#allocation6] sm:$0x3]  ;;  %s250_s10 = smov [#allocation7]   ;;  %vm137_vm0 = vcmask 1040384  }
   0xd   :  { %s158_s19 = sld [smem:[#allocation2 + $0x4]]  ;;  %s145_s11 = sshll.u32 %s250_s10, 4  ;;  %s146_s11 = int_to_ptr.vmem [resolvable:$true] %s145_s11 }
   0xe   :  { %s159_s0 = sld [smem:[#allocation2 + $0x8]]  ;;  %s147_s14 = sshll.u32 %s295_s2, 4  ;;  %s148_s14 = int_to_ptr.hbm [resolvable:$true] %s147_s14 }
   0xf   :  { %s160_s20 = sld [smem:[#allocation2 + $0x1]] }
  0x10   :  { %s161_s21 = sld [smem:[#allocation2 + $0x5]] }
  0x11   :  { %s272_s22 = sld [smem:[#allocation2 + $0x9]] }
  0x12   :  { %v41_v1 = vstv %s40_s18  ;;  %s163_s1 = sld [smem:[#allocation2 + $0x2]] }
  0x13   :  { %v44_v2 = vstv %s158_s19  ;;  %s164_s23 = sld [smem:[#allocation2 + $0x6]]  ;;  %v42_v3 = vmul.f32 %v41_v1, %v39_v0 }
  0x14   :  { %v45_v4 = vmul.f32 %v44_v2, %v39_v0  ;;  %s274_s24 = sld [smem:[#allocation2 + $0xa]]  ;;  %v51_v8 = vstv %s159_s0 }
  0x15   :  { %v55_v5 = vstv %s160_s20  ;;  %s166_s25 = sld [smem:[#allocation2 + $0x3]] }
  0x16   :  { %v47_v6 = vrot.slane %v45_v4, 1  ;;  %v58_v7 = vstv %s161_s21  ;;  %s167_s26 = sld [smem:[#allocation2 + $0x7]]  ;;  %v56_v9 = vmul.f32 %v55_v5, %v39_v0 }
  0x17   :  { %v59_v10 = vmul.f32 %v58_v7, %v39_v0  ;;  %s276_s27 = sld [smem:[#allocation2 + $0xb]]  ;;  %v65_v16 = vstv %s272_s22 }
  0x18   :  { %v49_v11 = vadd.f32 %v47_v6, %v42_v3  ;;  %v69_v12 = vstv %s163_s1  ;;  %s169_s28 = sld [smem:[#allocation2 + $0xc]] }
  0x19   :  { %v61_v13 = vrot.slane %v59_v10, 1  ;;  %v72_v14 = vstv %s164_s23  ;;  %s170_s29 = sld [smem:[#allocation2 + $0xe]]  ;;  %v70_v17 = vmul.f32 %v69_v12, %v39_v0 }
  0x1a   :  { %v52_v15 = vadd.f32 %v51_v8, %v49_v11  ;;  %v73_v18 = vmul.f32 %v72_v14, %v39_v0  ;;  %s279_s30 = sld [smem:[#allocation2 + $0x10]]  ;;  %v79_v22 = vstv %s274_s24 }
  0x1b   :  { %v63_v19 = vadd.f32 %v61_v13, %v56_v9  ;;  %v83_v20 = vstv %s166_s25  ;;  %s281_s3 = sld [smem:[#allocation2 + $0x12]] }
  0x1c   :  { %v75_v21 = vrot.slane %v73_v18, 1  ;;  %v86_v23 = vstv %s167_s26  ;;  %s284_s4 = sld [smem:[#allocation2 + $0x14]]  ;;  %v53_v24 = vmax.f32 %v52_v15, 0.0  ;;  %v84_v26 = vmul.f32 %v83_v20, %v39_v0 }
  0x1d   :  { %v66_v25 = vadd.f32 %v65_v16, %v63_v19  ;;  %v87_v27 = vmul.f32 %v86_v23, %v39_v0  ;;  %s174_s5 = sld [smem:[#allocation2 + $0xd]]  ;;  %v93_v35 = vstv %s276_s27 }
  0x1e   :  { %v77_v28 = vadd.f32 %v75_v21, %v70_v17  ;;  %v97_v29 = vstv %s169_s28  ;;  %s175_s6 = sld [smem:[#allocation2 + $0xf]] }
  0x1f   :  { %v67_v30 = vmax.f32 %v66_v25, 0.0  ;;  %v89_v31 = vrot.slane %v87_v27, 1  ;;  %v98_v32 = vmul.f32 %v97_v29, %v53_v24  ;;  %v100_v33 = vstv %s170_s29  ;;  %s176_s7 = sld [smem:[#allocation2 + $0x11]] }
  0x20   :  { %v80_v34 = vadd.f32 %v79_v22, %v77_v28  ;;  %s177_s8 = sld [smem:[#allocation2 + $0x13]]  ;;  %v104_v38 = vstv %s279_s30 }
  0x21   :  { %v91_v36 = vadd.f32 %v89_v31, %v84_v26  ;;  %v101_v37 = vmul.f32 %v100_v33, %v67_v30  ;;  %s178_s9 = sld [smem:[#allocation2 + $0x15]]  ;;  %v108_v44 = vstv %s281_s3 }
  0x22   :  { %v81_v39 = vmax.f32 %v80_v34, 0.0  ;;  %v112_v56 = vstv %s284_s4 }
  0x23   :  { %v94_v40 = vadd.f32 %v93_v35, %v91_v36  ;;  %v102_v41 = vadd.f32 %v101_v37, %v98_v32  ;;  %v116_v42 = vstv %s174_s5 }
  0x24   :  { %v105_v43 = vmul.f32 %v104_v38, %v81_v39  ;;  %v117_v45 = vmul.f32 %v116_v42, %v53_v24  ;;  %v119_v46 = vstv %s175_s6 }
  0x25   :  { %v95_v47 = vmax.f32 %v94_v40, 0.0  ;;  %v120_v48 = vmul.f32 %v119_v46, %v67_v30  ;;  %v123_v49 = vstv %s176_s7 }
  0x26   :  { %v106_v50 = vadd.f32 %v105_v43, %v102_v41  ;;  %v124_v51 = vmul.f32 %v123_v49, %v81_v39  ;;  %v127_v52 = vstv %s177_s8 }
  0x27   :  { %v109_v53 = vmul.f32 %v108_v44, %v95_v47  ;;  %v121_v54 = vadd.f32 %v120_v48, %v117_v45  ;;  %v128_v55 = vmul.f32 %v127_v52, %v95_v47  ;;  %v131_v59 = vstv %s178_s9 }
  0x29   :  { %v110_v57 = vadd.f32 %v109_v53, %v106_v50  ;;  %v125_v58 = vadd.f32 %v124_v51, %v121_v54 }
  0x2b   :  { %v113_v60 = vadd.f32 %v112_v56, %v110_v57  ;;  %v129_v61 = vadd.f32 %v128_v55, %v125_v58 }
  0x2d   :  { %v132_v62 = vadd.f32 %v131_v59, %v129_v61  ;;  %v114_v63 = vmax.f32 %v113_v60, 0.0 }
  0x2f   :  { %v133_v0 = vmax.f32 %v132_v62, 0.0 }
  0x31   :  { %v135_v1 = vrot.slane %v133_v0, 7 }
  0x33   :  { %v138_v2 = vsel %vm137_vm0, %v114_v63, %v135_v1 }
  0x34   :  { %139 = vst [vmem:[#allocation7] sm:$0x3] %v138_v2 }
  0x35   :  { %150 = dma.vmem_to_hbm [thread:$0]  %s146_s11, 32, %s148_s14, [#allocation4]  }
  0x36   :  { %246 = dma.done.wait [#allocation4], 32  }
  0x37   :  { %247 = vsyncadd [#allocation4], 4294967264 }
  0x38   :  { %155 = vsyncpa [#allocation3], 1 }
  0x39   :  { %156 = vsyncpa [#allocation4], 1 }
  0x3a   :  { %157 = vsyncpa [#allocation5], 1 }

</bundles_post_ra>
